<compile_context>
chip_gen: v6e
topology: v6e:2x2x1
jax: 0.10.0
libtpu: 0.0.40
codegen_flags: <defaults>
</compile_context>

<pallas_src>
import functools
import numpy as np

import jax
import jax.numpy as jnp
from jax.experimental import pallas as pl
from jax.experimental.pallas import tpu as pltpu

# ----------------------------------------------------------------------------
# Model constants
# ----------------------------------------------------------------------------
VOCAB = 79
VOCAB_PAD = 128          # vocab head padded to a full 128-lane vreg
START_TOK = 77
END_TOK = 78
D_MODEL = 32
D_FF = 64
ENC_FEAT = 48
PATCH = 4
L_MAX = 128              # fixed decode buffer length -> single compile for all steps
NEG_INF = -1e30


def _vmem():
    return pl.BlockSpec(memory_space=pltpu.MemorySpace.VMEM)


def _smem():
    return pl.BlockSpec(memory_space=pltpu.MemorySpace.SMEM)


def _ln(x, g, b):
    mu = jnp.mean(x, axis=-1, keepdims=True)
    var = jnp.mean((x - mu) ** 2, axis=-1, keepdims=True)
    return (x - mu) * jax.lax.rsqrt(var + 1e-5) * g + b


def _softmax_last(x):
    m = jnp.max(x, axis=-1, keepdims=True)
    e = jnp.exp(x - m)
    return e * pl.reciprocal(jnp.sum(e, axis=-1, keepdims=True), approx=True)


# ----------------------------------------------------------------------------
# Fused encoder kernel: patchify-conv, encoder_dim, transformer encoder layer,
# and the (hoisted) cross-attention K/V projections.
# Gridded over images: one pallas_call handles every image ("parallel" axis).
# ----------------------------------------------------------------------------
_ENC_W = ("cnn_w", "cnn_b", "dim_w", "dim_b", "enc_qkv_w", "enc_qkv_b",
          "enc_o_w", "enc_o_b", "enc_ln1_g", "enc_ln1_b",
          "enc_ff1_w", "enc_ff1_b", "enc_ff2_w", "enc_ff2_b",
          "enc_ln2_g", "enc_ln2_b", "ca_k_w", "ca_k_b", "ca_v_w", "ca_v_b")


def _encode_kernel(patches_ref, *rest):
    w = dict(zip(_ENC_W, rest[:len(_ENC_W)]))
    ca_k_ref, ca_v_ref = rest[len(_ENC_W):]
    bf16, f32 = jnp.bfloat16, jnp.float32
    scale = 1.0 / float(np.sqrt(D_MODEL))

    patches = patches_ref[0].astype(bf16)                                     # (S, C*P*P)
    feat = jnp.dot(patches, w["cnn_w"][...], preferred_element_type=f32) + w["cnn_b"][...]
    x = jnp.dot(feat.astype(bf16), w["dim_w"][...], preferred_element_type=f32) + w["dim_b"][...]

    # encoder self-attention (no mask) with folded QKV weights
    qkv = jnp.dot(x.astype(bf16), w["enc_qkv_w"][...], preferred_element_type=f32) + w["enc_qkv_b"][...]
    q, k, v = qkv[:, :D_MODEL], qkv[:, D_MODEL:2 * D_MODEL], qkv[:, 2 * D_MODEL:]
    s = jnp.einsum("qd,kd->qk", q.astype(bf16), k.astype(bf16),
                   preferred_element_type=f32) * scale
    p = _softmax_last(s)
    a = jnp.dot(p.astype(bf16), v.astype(bf16), preferred_element_type=f32)
    x = _ln(x + jnp.dot(a.astype(bf16), w["enc_o_w"][...], preferred_element_type=f32) + w["enc_o_b"][...],
            w["enc_ln1_g"][...], w["enc_ln1_b"][...])

    h = jnp.maximum(jnp.dot(x.astype(bf16), w["enc_ff1_w"][...],
                            preferred_element_type=f32) + w["enc_ff1_b"][...], 0.0)
    x = _ln(x + jnp.dot(h.astype(bf16), w["enc_ff2_w"][...], preferred_element_type=f32) + w["enc_ff2_b"][...],
            w["enc_ln2_g"][...], w["enc_ln2_b"][...])

    # hoisted cross-attention K/V: constant over all decode steps and beams
    xb = x.astype(bf16)
    ca_k_ref[0] = (jnp.dot(xb, w["ca_k_w"][...], preferred_element_type=f32) + w["ca_k_b"][...]).astype(bf16)
    ca_v_ref[0] = (jnp.dot(xb, w["ca_v_w"][...], preferred_element_type=f32) + w["ca_v_b"][...]).astype(bf16)


def make_encoder(pp):
    weights = tuple(pp[n] for n in _ENC_W)

    @jax.jit
    def encode(imgs):                                   # (n_img, C, H, W)
        n_img, C, H, W = imgs.shape
        hp, wp = H // PATCH, W // PATCH
        S = hp * wp
        Pd = C * PATCH * PATCH
        patches = imgs.reshape(n_img, C, hp, PATCH, wp, PATCH).transpose(0, 2, 4, 1, 3, 5)
        patches = patches.reshape(n_img, S, Pd).astype(jnp.float32)
        out_blk = pl.BlockSpec((1, S, D_MODEL), lambda i: (i, 0, 0))
        return pl.pallas_call(
            _encode_kernel,
            grid=(n_img,),
            out_shape=(jax.ShapeDtypeStruct((n_img, S, D_MODEL), jnp.bfloat16),   # cross-attn K
                       jax.ShapeDtypeStruct((n_img, S, D_MODEL), jnp.bfloat16)),  # cross-attn V
            in_specs=[pl.BlockSpec((1, S, Pd), lambda i: (i, 0, 0))] + [_vmem()] * len(weights),
            out_specs=(out_blk, out_blk),
            compiler_params=pltpu.CompilerParams(dimension_semantics=("parallel",)),
        )(patches, *weights)

    return encode


# ----------------------------------------------------------------------------
# Fused decode-step kernel: one call per generated token, all images handled
# inside the kernel (static unroll), last-token-only query path.
# ----------------------------------------------------------------------------
_DEC_W = ("embed", "pos", "sa_q_w", "sa_q_b", "sa_kv_w", "sa_kv_b",
          "sa_o_w", "sa_o_b", "dec_ln1_g", "dec_ln1_b",
          "ca_q_w", "ca_q_b", "ca_o_w", "ca_o_b", "dec_ln2_g", "dec_ln2_b",
          "dec_ff1_w", "dec_ff1_b", "dec_ff2_w", "dec_ff2_b",
          "dec_ln3_g", "dec_ln3_b", "out_w", "out_b")


def _decode_step_kernel(len_ref, tok_ref, ca_k_ref, ca_v_ref, *rest, n_img):
    w = dict(zip(_DEC_W, rest[:len(_DEC_W)]))
    logits_ref, psum_ref = rest[len(_DEC_W):]
    bf16, f32 = jnp.bfloat16, jnp.float32
    B, Lm = tok_ref.shape
    D = D_MODEL
    scale = 1.0 / float(np.sqrt(D))

    L = len_ref[0]                                   # true current sequence length (SMEM scalar)

    # token + positional embeddings for the fixed-length buffer (one-hot matmul = MXU gather)
    tok = tok_ref[...]                                                            # (B, Lm) int32
    oh = jnp.where(tok.reshape(B * Lm, 1) ==
                   jax.lax.broadcasted_iota(jnp.int32, (1, VOCAB_PAD), 1),
                   1.0, 0.0).astype(bf16)                                         # (B*Lm, VPAD)
    emb = jnp.dot(oh, w["embed"][...], preferred_element_type=f32)                # (B*Lm, D)
    x_full = emb.reshape(B, Lm, D) + w["pos"][...][None]                          # (B, Lm, D)

    # select the last real position -> query path is O(1) per step
    sel = jnp.where(jax.lax.broadcasted_iota(jnp.int32, (1, Lm, 1), 1) == (L - 1), 1.0, 0.0)
    x_last = jnp.sum(x_full * sel, axis=1)                                        # (B, D)

    # ---- masked self-attention: single query, K/V over the whole prefix --------------------
    kv = (jnp.dot(x_full.reshape(B * Lm, D).astype(bf16), w["sa_kv_w"][...],
                  preferred_element_type=f32) + w["sa_kv_b"][...]).reshape(B, Lm, 2 * D)
    k_full, v_full = kv[:, :, :D], kv[:, :, D:]
    q = jnp.dot(x_last.astype(bf16), w["sa_q_w"][...], preferred_element_type=f32) + w["sa_q_b"][...]
    s = jnp.einsum("bqd,bkd->bqk", q[:, None, :].astype(bf16), k_full.astype(bf16),
                   preferred_element_type=f32) * scale                            # (B, 1, Lm)
    key_idx = jax.lax.broadcasted_iota(jnp.int32, (1, 1, Lm), 2)
    s = jnp.where(key_idx < L, s, NEG_INF)            # causal mask for last query + pad mask
    p = _softmax_last(s)
    a = jnp.einsum("bqk,bkd->bqd", p.astype(bf16), v_full.astype(bf16),
                   preferred_element_type=f32)[:, 0, :]                           # (B, D)

    x = _ln(x_last + jnp.dot(a.astype(bf16), w["sa_o_w"][...],
                             preferred_element_type=f32) + w["sa_o_b"][...],
            w["dec_ln1_g"][...], w["dec_ln1_b"][...])

    # cross-attention query is shared by every image (memory identical per beam -> broadcast)
    q2 = jnp.dot(x.astype(bf16), w["ca_q_w"][...], preferred_element_type=f32) + w["ca_q_b"][...]

    psum = None
    for j in range(n_img):                                                        # static unroll
        ck, cv = ca_k_ref[j], ca_v_ref[j]                                         # (S, D) bf16
        s2 = jnp.einsum("bd,sd->bs", q2.astype(bf16), ck, preferred_element_type=f32) * scale
        p2 = _softmax_last(s2)
        a2 = jnp.dot(p2.astype(bf16), cv, preferred_element_type=f32)             # (B, D)
        xj = _ln(x + jnp.dot(a2.astype(bf16), w["ca_o_w"][...],
                             preferred_element_type=f32) + w["ca_o_b"][...],
                 w["dec_ln2_g"][...], w["dec_ln2_b"][...])
        h = jnp.maximum(jnp.dot(xj.astype(bf16), w["dec_ff1_w"][...],
                                preferred_element_type=f32) + w["dec_ff1_b"][...], 0.0)
        xj = _ln(xj + jnp.dot(h.astype(bf16), w["dec_ff2_w"][...],
                              preferred_element_type=f32) + w["dec_ff2_b"][...],
                 w["dec_ln3_g"][...], w["dec_ln3_b"][...])
        # padded (lane-dense) vocab head; pad columns carry a -1e9 bias -> 0 probability
        logits = jnp.dot(xj.astype(bf16), w["out_w"][...],
                         preferred_element_type=f32) + w["out_b"][...]            # (B, VPAD)
        logits_ref[j] = logits
        pr = _softmax_last(logits)
        psum = pr if psum is None else psum + pr
    psum_ref[...] = psum


def make_decode_step(pp, n_img, beam):
    weights = tuple(pp[n] for n in _DEC_W)
    call = pl.pallas_call(
        functools.partial(_decode_step_kernel, n_img=n_img),
        out_shape=(jax.ShapeDtypeStruct((n_img, beam, VOCAB_PAD), jnp.float32),  # per-image logits
                   jax.ShapeDtypeStruct((beam, VOCAB_PAD), jnp.float32)),        # sum of softmaxes
        in_specs=[_smem()] + [_vmem()] * (3 + len(weights)),
        out_specs=(_vmem(), _vmem()),
    )

    @jax.jit
    def step(cur_len, tokens, ca_k, ca_v):
        return call(cur_len, tokens, ca_k, ca_v, *weights)

    return step


# ----------------------------------------------------------------------------
# Deterministic synthetic parameters + TPU-friendly preparation (bf16 matmul
# weights, folded QKV, lane-padded vocab head, 2D biases).
# ----------------------------------------------------------------------------
def init_params(key, *, C=4, P=PATCH, enc_feat=ENC_FEAT, d_model=D_MODEL, d_ff=D_FF,
                vocab=VOCAB, max_pos=L_MAX):
    ks = iter(jax.random.split(key, 32))

    def nrm(shape, scale):
        return (scale * jax.random.normal(next(ks), shape)).astype(jnp.float32)

    patch_dim = C * P * P
    z = lambda n: jnp.zeros((n,), jnp.float32)
    o = lambda n: jnp.ones((n,), jnp.float32)
    p = {}
    p["cnn_w"], p["cnn_b"] = nrm((patch_dim, enc_feat), 1 / np.sqrt(patch_dim)), z(enc_feat)
    p["dim_w"], p["dim_b"] = nrm((enc_feat, d_model), 1 / np.sqrt(enc_feat)), z(d_model)
    for n in ("enc_q", "enc_k", "enc_v", "enc_o"):
        p[n + "_w"], p[n + "_b"] = nrm((d_model, d_model), 1 / np.sqrt(d_model)), z(d_model)
    p["enc_ff1_w"], p["enc_ff1_b"] = nrm((d_model, d_ff), 1 / np.sqrt(d_model)), z(d_ff)
    p["enc_ff2_w"], p["enc_ff2_b"] = nrm((d_ff, d_model), 1 / np.sqrt(d_ff)), z(d_model)
    p["enc_ln1_g"], p["enc_ln1_b"] = o(d_model), z(d_model)
    p["enc_ln2_g"], p["enc_ln2_b"] = o(d_model), z(d_model)
    p["embed"] = nrm((vocab, d_model), 0.02)
    p["pos"] = nrm((max_pos, d_model), 0.02)
    for n in ("sa_q", "sa_k", "sa_v", "sa_o", "ca_q", "ca_k", "ca_v", "ca_o"):
        p[n + "_w"], p[n + "_b"] = nrm((d_model, d_model), 1 / np.sqrt(d_model)), z(d_model)
    p["dec_ff1_w"], p["dec_ff1_b"] = nrm((d_model, d_ff), 1 / np.sqrt(d_model)), z(d_ff)
    p["dec_ff2_w"], p["dec_ff2_b"] = nrm((d_ff, d_model), 1 / np.sqrt(d_ff)), z(d_model)
    for n in ("dec_ln1", "dec_ln2", "dec_ln3"):
        p[n + "_g"], p[n + "_b"] = o(d_model), z(d_model)
    p["out_w"], p["out_b"] = nrm((d_model, vocab), 1 / np.sqrt(d_model)), z(vocab)
    return p


def prepare_params(p):
    bf = lambda a: jnp.asarray(a, jnp.bfloat16)
    f32 = lambda a: jnp.asarray(a, jnp.float32)
    row = lambda a: f32(a).reshape(1, -1)
    pp = {}
    # encoder
    pp["cnn_w"], pp["cnn_b"] = bf(p["cnn_w"]), row(p["cnn_b"])
    pp["dim_w"], pp["dim_b"] = bf(p["dim_w"]), row(p["dim_b"])
    pp["enc_qkv_w"] = bf(jnp.concatenate([p["enc_q_w"], p["enc_k_w"], p["enc_v_w"]], axis=1))
    pp["enc_qkv_b"] = row(jnp.concatenate([p["enc_q_b"], p["enc_k_b"], p["enc_v_b"]]))
    pp["enc_o_w"], pp["enc_o_b"] = bf(p["enc_o_w"]), row(p["enc_o_b"])
    pp["enc_ln1_g"], pp["enc_ln1_b"] = row(p["enc_ln1_g"]), row(p["enc_ln1_b"])
    pp["enc_ff1_w"], pp["enc_ff1_b"] = bf(p["enc_ff1_w"]), row(p["enc_ff1_b"])
    pp["enc_ff2_w"], pp["enc_ff2_b"] = bf(p["enc_ff2_w"]), row(p["enc_ff2_b"])
    pp["enc_ln2_g"], pp["enc_ln2_b"] = row(p["enc_ln2_g"]), row(p["enc_ln2_b"])
    pp["ca_k_w"], pp["ca_k_b"] = bf(p["ca_k_w"]), row(p["ca_k_b"])
    pp["ca_v_w"], pp["ca_v_b"] = bf(p["ca_v_w"]), row(p["ca_v_b"])
    # decoder
    pp["embed"] = bf(jnp.zeros((VOCAB_PAD, D_MODEL), jnp.float32).at[:VOCAB].set(p["embed"]))
    pp["pos"] = f32(p["pos"][:L_MAX])
    pp["sa_q_w"], pp["sa_q_b"] = bf(p["sa_q_w"]), row(p["sa_q_b"])
    pp["sa_kv_w"] = bf(jnp.concatenate([p["sa_k_w"], p["sa_v_w"]], axis=1))
    pp["sa_kv_b"] = row(jnp.concatenate([p["sa_k_b"], p["sa_v_b"]]))
    pp["sa_o_w"], pp["sa_o_b"] = bf(p["sa_o_w"]), row(p["sa_o_b"])
    pp["dec_ln1_g"], pp["dec_ln1_b"] = row(p["dec_ln1_g"]), row(p["dec_ln1_b"])
    pp["ca_q_w"], pp["ca_q_b"] = bf(p["ca_q_w"]), row(p["ca_q_b"])
    pp["ca_o_w"], pp["ca_o_b"] = bf(p["ca_o_w"]), row(p["ca_o_b"])
    pp["dec_ln2_g"], pp["dec_ln2_b"] = row(p["dec_ln2_g"]), row(p["dec_ln2_b"])
    pp["dec_ff1_w"], pp["dec_ff1_b"] = bf(p["dec_ff1_w"]), row(p["dec_ff1_b"])
    pp["dec_ff2_w"], pp["dec_ff2_b"] = bf(p["dec_ff2_w"]), row(p["dec_ff2_b"])
    pp["dec_ln3_g"], pp["dec_ln3_b"] = row(p["dec_ln3_g"]), row(p["dec_ln3_b"])
    pp["out_w"] = bf(jnp.zeros((D_MODEL, VOCAB_PAD), jnp.float32).at[:, :VOCAB].set(p["out_w"]))
    pp["out_b"] = row(jnp.full((VOCAB_PAD,), -1e9, jnp.float32).at[:VOCAB].set(p["out_b"]))
    return pp


# ----------------------------------------------------------------------------
# Host-side helpers (same semantics as the PyTorch free functions)
# ----------------------------------------------------------------------------
def pad_pack(sequences):
    maxlen = max(len(s) for s in sequences)
    batch = np.zeros((len(sequences), maxlen), dtype=np.int32)
    for i, s in enumerate(sequences):
        batch[i, : len(s)] = np.asarray(s, dtype=np.int32)
    return batch, maxlen


def top_k_2d(m, k):
    flat = m.reshape(-1)
    idx = np.argsort(-flat, kind="stable")[:k]
    return idx // m.shape[1], idx % m.shape[1]


def triangle_mask(size):
    return 1 - np.triu(np.ones((1, size, size), dtype=np.float32), k=1)


# ----------------------------------------------------------------------------
# SMILESGenerator: fused Pallas kernels on TPU, beam-search glue on host
# ----------------------------------------------------------------------------
class SMILESGenerator:
    def __init__(self, params):
        self.pp = prepare_params(params)
        self._encode = make_encoder(self.pp)
        self._step_cache = {}
        self.out = []

    def _decode_step_fn(self, n_img, beam):
        key = (n_img, beam)
        if key not in self._step_cache:
            self._step_cache[key] = make_decode_step(self.pp, n_img, beam)
        return self._step_cache[key]

    def predict_next(self, i, out, beam, alpha):
        factor = np.ones(self.top_n_p.shape, dtype=np.float64)
        if i >= 1:
            for j in range(beam):
                if self.top_n[j][-1] == END_TOK:
                    out[j] = np.zeros(VOCAB, dtype=np.float64)
                    out[j][END_TOK] = 1.0
                L = len(self.top_n[0])       # mirrors the original module (top_n[0], then override)
                nz = np.nonzero(np.asarray(self.top_n[j]) == END_TOK)[0]
                if len(nz) > 0:
                    L = int(nz[0]) + 1
                factor[j] = L
        with np.errstate(divide="ignore"):
            tmp_n = (self.top_n_p[:, None] + np.log(out)) * (1.0 / factor ** alpha)[:, None]
        x, y = top_k_2d(tmp_n, beam)
        if i == 0:
            factor = np.ones(beam, dtype=np.float64)
        new_top_n, new_top_n_p = [], []
        for j in range(beam):
            new_top_n.append(list(self.top_n[int(x[j])]) + [int(y[j])])
            new_top_n_p.append(tmp_n[int(x[j]), int(y[j])] / (1.0 / factor[j] ** alpha))
        self.top_n = new_top_n
        self.top_n_p = np.asarray(new_top_n_p, dtype=np.float64)

    def forward(self, images, text_in_=[[START_TOK]], max_len=100, beam=1, alpha=0.75, method="sum"):
        assert max_len <= L_MAX
        n_img = len(images)
        # encode all images in ONE gridded pallas_call; cross-attention K/V hoisted out of the
        # token loop and shared across beams/steps.
        shapes = {tuple(np.asarray(img.shape)) for img in images}
        if len(shapes) == 1:
            ca_k, ca_v = self._encode(jnp.concatenate([jnp.asarray(img) for img in images], axis=0))
        else:
            ks, vs = [], []
            for img in images:
                k_, v_ = self._encode(jnp.asarray(img))
                ks.append(k_)
                vs.append(v_)
            ca_k, ca_v = jnp.concatenate(ks, axis=0), jnp.concatenate(vs, axis=0)
        step_fn = self._decode_step_fn(n_img, beam)

        self.top_n = [list(t) for t in text_in_]
        self.top_n_p = np.array([0.0], dtype=np.float64)
        # TODO(synk): beam bookkeeping (log, length penalty, top-k, termination) still runs on
        # host each step; moving it on-device (lax.while_loop + lax.top_k) would also remove the
        # remaining per-token device<->host round trip.
        for i in range(max_len):
            Bt = len(self.top_n)                       # 1 at step 0, == beam afterwards
            cur_len = len(self.top_n[0])               # all live beams share the same length
            tok_buf = np.zeros((beam, L_MAX), dtype=np.int32)
            for r in range(beam):
                src = self.top_n[r] if r < Bt else self.top_n[0]
                tok_buf[r, :cur_len] = np.asarray(src, dtype=np.int32)
            logits, probs_sum = step_fn(jnp.asarray([cur_len], dtype=jnp.int32),
                                        jnp.asarray(tok_buf), ca_k, ca_v)
            self.out.append(logits[:, :Bt, :VOCAB])    # per-image last-token logits (stays on device)
            if method == "sum":
                out_sum = probs_sum[:Bt, :VOCAB]       # sum over images of softmax(logits)
            else:
                print("BOOOM")
                raise TypeError()
            self.predict_next(i, np.asarray(jax.device_get(out_sum), dtype=np.float64), beam, alpha)
            if sum(1 for s in self.top_n if END_TOK in s) == beam:
                return self.top_n, self.top_n_p
        return self.top_n, self.top_n_p


if __name__ == "__main__":
    key = jax.random.PRNGKey(0)
    pkey, ikey = jax.random.split(key)
    params = init_params(pkey)

    # two NCHW images, shape (1, 4, 16, 16) each
    img_keys = jax.random.split(ikey, 2)
    images = [jax.random.normal(k, (1, 4, 16, 16), dtype=jnp.float32) for k in img_keys]

    gen = SMILESGenerator(params)
    top_n, top_n_p = gen.forward(images, text_in_=[[START_TOK]], max_len=6, beam=2, alpha=0.75)
    jax.block_until_ready(gen.out[-1])
    assert len(top_n) == 2 and top_n_p.shape == (2,)
    print("KERNEL_OK")
</pallas_src>

<mosaic_0001>
module attributes {stable_mosaic.version = 11 : i64} {
  func.func @_encode_kernel(%arg0: i32, %arg1: memref<1x16x64xf32, #tpu.memory_space<vmem>>, %arg2: memref<64x48xbf16, #tpu.memory_space<vmem>>, %arg3: memref<1x48xf32, #tpu.memory_space<vmem>>, %arg4: memref<48x32xbf16, #tpu.memory_space<vmem>>, %arg5: memref<1x32xf32, #tpu.memory_space<vmem>>, %arg6: memref<32x96xbf16, #tpu.memory_space<vmem>>, %arg7: memref<1x96xf32, #tpu.memory_space<vmem>>, %arg8: memref<32x32xbf16, #tpu.memory_space<vmem>>, %arg9: memref<1x32xf32, #tpu.memory_space<vmem>>, %arg10: memref<1x32xf32, #tpu.memory_space<vmem>>, %arg11: memref<1x32xf32, #tpu.memory_space<vmem>>, %arg12: memref<32x64xbf16, #tpu.memory_space<vmem>>, %arg13: memref<1x64xf32, #tpu.memory_space<vmem>>, %arg14: memref<64x32xbf16, #tpu.memory_space<vmem>>, %arg15: memref<1x32xf32, #tpu.memory_space<vmem>>, %arg16: memref<1x32xf32, #tpu.memory_space<vmem>>, %arg17: memref<1x32xf32, #tpu.memory_space<vmem>>, %arg18: memref<32x32xbf16, #tpu.memory_space<vmem>>, %arg19: memref<1x32xf32, #tpu.memory_space<vmem>>, %arg20: memref<32x32xbf16, #tpu.memory_space<vmem>>, %arg21: memref<1x32xf32, #tpu.memory_space<vmem>>, %arg22: memref<1x16x32xbf16, #tpu.memory_space<vmem>>, %arg23: memref<1x16x32xbf16, #tpu.memory_space<vmem>>) attributes {dimension_semantics = [#tpu.dimension_semantics<parallel>], iteration_bounds = array<i64: 2>, scalar_prefetch = 0 : i64, scratch_operands = 0 : i64, tpu.core_type = #tpu.core_type<tc>, window_params = [{transform_indices = @transform_0, window_bounds = array<i64: 1, 16, 64>}, {pipeline_mode = #tpu.pipeline_mode<synchronous>, transform_indices = @transform_1, window_bounds = array<i64: 64, 48>}, {pipeline_mode = #tpu.pipeline_mode<synchronous>, transform_indices = @transform_2, window_bounds = array<i64: 1, 48>}, {pipeline_mode = #tpu.pipeline_mode<synchronous>, transform_indices = @transform_3, window_bounds = array<i64: 48, 32>}, {pipeline_mode = #tpu.pipeline_mode<synchronous>, transform_indices = @transform_4, window_bounds = array<i64: 1, 32>}, {pipeline_mode = #tpu.pipeline_mode<synchronous>, transform_indices = @transform_5, window_bounds = array<i64: 32, 96>}, {pipeline_mode = #tpu.pipeline_mode<synchronous>, transform_indices = @transform_6, window_bounds = array<i64: 1, 96>}, {pipeline_mode = #tpu.pipeline_mode<synchronous>, transform_indices = @transform_7, window_bounds = array<i64: 32, 32>}, {pipeline_mode = #tpu.pipeline_mode<synchronous>, transform_indices = @transform_8, window_bounds = array<i64: 1, 32>}, {pipeline_mode = #tpu.pipeline_mode<synchronous>, transform_indices = @transform_9, window_bounds = array<i64: 1, 32>}, {pipeline_mode = #tpu.pipeline_mode<synchronous>, transform_indices = @transform_10, window_bounds = array<i64: 1, 32>}, {pipeline_mode = #tpu.pipeline_mode<synchronous>, transform_indices = @transform_11, window_bounds = array<i64: 32, 64>}, {pipeline_mode = #tpu.pipeline_mode<synchronous>, transform_indices = @transform_12, window_bounds = array<i64: 1, 64>}, {pipeline_mode = #tpu.pipeline_mode<synchronous>, transform_indices = @transform_13, window_bounds = array<i64: 64, 32>}, {pipeline_mode = #tpu.pipeline_mode<synchronous>, transform_indices = @transform_14, window_bounds = array<i64: 1, 32>}, {pipeline_mode = #tpu.pipeline_mode<synchronous>, transform_indices = @transform_15, window_bounds = array<i64: 1, 32>}, {pipeline_mode = #tpu.pipeline_mode<synchronous>, transform_indices = @transform_16, window_bounds = array<i64: 1, 32>}, {pipeline_mode = #tpu.pipeline_mode<synchronous>, transform_indices = @transform_17, window_bounds = array<i64: 32, 32>}, {pipeline_mode = #tpu.pipeline_mode<synchronous>, transform_indices = @transform_18, window_bounds = array<i64: 1, 32>}, {pipeline_mode = #tpu.pipeline_mode<synchronous>, transform_indices = @transform_19, window_bounds = array<i64: 32, 32>}, {pipeline_mode = #tpu.pipeline_mode<synchronous>, transform_indices = @transform_20, window_bounds = array<i64: 1, 32>}, {transform_indices = @transform_21, window_bounds = array<i64: 1, 16, 32>}, {transform_indices = @transform_22, window_bounds = array<i64: 1, 16, 32>}]} {
    %c0 = arith.constant 0 : index
    %c0_0 = arith.constant 0 : index
    %c0_1 = arith.constant 0 : index
    %0 = vector.load %arg1[%c0, %c0_0, %c0_1] : memref<1x16x64xf32, #tpu.memory_space<vmem>>, vector<1x16x64xf32>
    %1 = vector.shape_cast %0 : vector<1x16x64xf32> to vector<16x64xf32>
    %2 = arith.truncf %1 : vector<16x64xf32> to vector<16x64xbf16>
    %c0_2 = arith.constant 0 : index
    %c0_3 = arith.constant 0 : index
    %3 = vector.load %arg2[%c0_2, %c0_3] : memref<64x48xbf16, #tpu.memory_space<vmem>>, vector<64x48xbf16>
    %cst = arith.constant dense<0.000000e+00> : vector<16x48xf32>
    %4 = tpu.matmul %2, %3, %cst {dimension_numbers = #tpu.dot_dimension_numbers<[1], [0], [0], [1], [0, 0, 1, 1], [], []>} : vector<16x64xbf16>, vector<64x48xbf16>, vector<16x48xf32> -> vector<16x48xf32>
    %c0_4 = arith.constant 0 : index
    %c0_5 = arith.constant 0 : index
    %5 = vector.load %arg3[%c0_4, %c0_5] : memref<1x48xf32, #tpu.memory_space<vmem>>, vector<1x48xf32>
    %6 = vector.broadcast %5 : vector<1x48xf32> to vector<16x48xf32>
    %7 = arith.addf %4, %6 : vector<16x48xf32>
    %8 = arith.truncf %7 : vector<16x48xf32> to vector<16x48xbf16>
    %c0_6 = arith.constant 0 : index
    %c0_7 = arith.constant 0 : index
    %9 = vector.load %arg4[%c0_6, %c0_7] : memref<48x32xbf16, #tpu.memory_space<vmem>>, vector<48x32xbf16>
    %cst_8 = arith.constant dense<0.000000e+00> : vector<16x32xf32>
    %10 = tpu.matmul %8, %9, %cst_8 {dimension_numbers = #tpu.dot_dimension_numbers<[1], [0], [0], [1], [0, 0, 1, 1], [], []>} : vector<16x48xbf16>, vector<48x32xbf16>, vector<16x32xf32> -> vector<16x32xf32>
    %c0_9 = arith.constant 0 : index
    %c0_10 = arith.constant 0 : index
    %11 = vector.load %arg5[%c0_9, %c0_10] : memref<1x32xf32, #tpu.memory_space<vmem>>, vector<1x32xf32>
    %12 = vector.broadcast %11 : vector<1x32xf32> to vector<16x32xf32>
    %13 = arith.addf %10, %12 : vector<16x32xf32>
    %14 = arith.truncf %13 : vector<16x32xf32> to vector<16x32xbf16>
    %c0_11 = arith.constant 0 : index
    %c0_12 = arith.constant 0 : index
    %15 = vector.load %arg6[%c0_11, %c0_12] : memref<32x96xbf16, #tpu.memory_space<vmem>>, vector<32x96xbf16>
    %cst_13 = arith.constant dense<0.000000e+00> : vector<16x96xf32>
    %16 = tpu.matmul %14, %15, %cst_13 {dimension_numbers = #tpu.dot_dimension_numbers<[1], [0], [0], [1], [0, 0, 1, 1], [], []>} : vector<16x32xbf16>, vector<32x96xbf16>, vector<16x96xf32> -> vector<16x96xf32>
    %c0_14 = arith.constant 0 : index
    %c0_15 = arith.constant 0 : index
    %17 = vector.load %arg7[%c0_14, %c0_15] : memref<1x96xf32, #tpu.memory_space<vmem>>, vector<1x96xf32>
    %18 = vector.broadcast %17 : vector<1x96xf32> to vector<16x96xf32>
    %19 = arith.addf %16, %18 : vector<16x96xf32>
    %20 = vector.extract_strided_slice %19 {offsets = [0, 0], sizes = [16, 32], strides = [1, 1]} : vector<16x96xf32> to vector<16x32xf32>
    %21 = vector.extract_strided_slice %19 {offsets = [0, 32], sizes = [16, 32], strides = [1, 1]} : vector<16x96xf32> to vector<16x32xf32>
    %22 = vector.extract_strided_slice %19 {offsets = [0, 64], sizes = [16, 32], strides = [1, 1]} : vector<16x96xf32> to vector<16x32xf32>
    %23 = arith.truncf %20 : vector<16x32xf32> to vector<16x32xbf16>
    %24 = arith.truncf %21 : vector<16x32xf32> to vector<16x32xbf16>
    "tpu.trace_start"() <{level = 10 : i32, message = "qd,kd->qk"}> : () -> ()
    %cst_16 = arith.constant dense<0.000000e+00> : vector<16x16xf32>
    %25 = tpu.matmul %23, %24, %cst_16 {dimension_numbers = #tpu.dot_dimension_numbers<[1], [1], [0], [0], [0, 0, 1, 0], [], []>} : vector<16x32xbf16>, vector<16x32xbf16>, vector<16x16xf32> -> vector<16x16xf32>
    "tpu.trace_stop"() : () -> ()
    %cst_17 = arith.constant 0.176776692 : f32
    %26 = vector.broadcast %cst_17 : f32 to vector<16x16xf32>
    %27 = arith.mulf %25, %26 : vector<16x16xf32>
    %cst_18 = arith.constant dense<0xFF800000> : vector<16xf32>
    %28 = vector.multi_reduction <maximumf>, %27, %cst_18 [1] : vector<16x16xf32> to vector<16xf32>
    %29 = vector.shape_cast %28 : vector<16xf32> to vector<16x1xf32>
    %30 = vector.broadcast %29 : vector<16x1xf32> to vector<16x16xf32>
    %31 = arith.subf %27, %30 : vector<16x16xf32>
    %32 = math.exp %31 : vector<16x16xf32>
    %cst_19 = arith.constant dense<0.000000e+00> : vector<16xf32>
    %33 = vector.multi_reduction <add>, %32, %cst_19 [1] : vector<16x16xf32> to vector<16xf32>
    %34 = vector.shape_cast %33 : vector<16xf32> to vector<16x1xf32>
    %35 = tpu.reciprocal %34 {approx = true} : vector<16x1xf32> -> vector<16x1xf32>
    %36 = vector.broadcast %35 : vector<16x1xf32> to vector<16x16xf32>
    %37 = arith.mulf %32, %36 : vector<16x16xf32>
    %38 = arith.truncf %37 : vector<16x16xf32> to vector<16x16xbf16>
    %39 = arith.truncf %22 : vector<16x32xf32> to vector<16x32xbf16>
    %cst_20 = arith.constant dense<0.000000e+00> : vector<16x32xf32>
    %40 = tpu.matmul %38, %39, %cst_20 {dimension_numbers = #tpu.dot_dimension_numbers<[1], [0], [0], [1], [0, 0, 1, 1], [], []>} : vector<16x16xbf16>, vector<16x32xbf16>, vector<16x32xf32> -> vector<16x32xf32>
    %41 = arith.truncf %40 : vector<16x32xf32> to vector<16x32xbf16>
    %c0_21 = arith.constant 0 : index
    %c0_22 = arith.constant 0 : index
    %42 = vector.load %arg8[%c0_21, %c0_22] : memref<32x32xbf16, #tpu.memory_space<vmem>>, vector<32x32xbf16>
    %cst_23 = arith.constant dense<0.000000e+00> : vector<16x32xf32>
    %43 = tpu.matmul %41, %42, %cst_23 {dimension_numbers = #tpu.dot_dimension_numbers<[1], [0], [0], [1], [0, 0, 1, 1], [], []>} : vector<16x32xbf16>, vector<32x32xbf16>, vector<16x32xf32> -> vector<16x32xf32>
    %44 = arith.addf %13, %43 : vector<16x32xf32>
    %c0_24 = arith.constant 0 : index
    %c0_25 = arith.constant 0 : index
    %45 = vector.load %arg9[%c0_24, %c0_25] : memref<1x32xf32, #tpu.memory_space<vmem>>, vector<1x32xf32>
    %46 = vector.broadcast %45 : vector<1x32xf32> to vector<16x32xf32>
    %47 = arith.addf %44, %46 : vector<16x32xf32>
    %c0_26 = arith.constant 0 : index
    %c0_27 = arith.constant 0 : index
    %48 = vector.load %arg10[%c0_26, %c0_27] : memref<1x32xf32, #tpu.memory_space<vmem>>, vector<1x32xf32>
    %c0_28 = arith.constant 0 : index
    %c0_29 = arith.constant 0 : index
    %49 = vector.load %arg11[%c0_28, %c0_29] : memref<1x32xf32, #tpu.memory_space<vmem>>, vector<1x32xf32>
    %cst_30 = arith.constant dense<0.000000e+00> : vector<16xf32>
    %50 = vector.multi_reduction <add>, %47, %cst_30 [1] : vector<16x32xf32> to vector<16xf32>
    %51 = vector.shape_cast %50 : vector<16xf32> to vector<16x1xf32>
    %cst_31 = arith.constant 3.200000e+01 : f32
    %52 = vector.broadcast %cst_31 : f32 to vector<16x1xf32>
    %53 = arith.divf %51, %52 : vector<16x1xf32>
    %54 = vector.broadcast %53 : vector<16x1xf32> to vector<16x32xf32>
    %55 = arith.subf %47, %54 : vector<16x32xf32>
    %56 = arith.mulf %55, %55 : vector<16x32xf32>
    %cst_32 = arith.constant dense<0.000000e+00> : vector<16xf32>
    %57 = vector.multi_reduction <add>, %56, %cst_32 [1] : vector<16x32xf32> to vector<16xf32>
    %58 = vector.shape_cast %57 : vector<16xf32> to vector<16x1xf32>
    %cst_33 = arith.constant 3.200000e+01 : f32
    %59 = vector.broadcast %cst_33 : f32 to vector<16x1xf32>
    %60 = arith.divf %58, %59 : vector<16x1xf32>
    %61 = vector.broadcast %53 : vector<16x1xf32> to vector<16x32xf32>
    %62 = arith.subf %47, %61 : vector<16x32xf32>
    %cst_34 = arith.constant 9.99999974E-6 : f32
    %63 = vector.broadcast %cst_34 : f32 to vector<16x1xf32>
    %64 = arith.addf %60, %63 : vector<16x1xf32>
    %65 = math.rsqrt %64 : vector<16x1xf32>
    %66 = vector.broadcast %65 : vector<16x1xf32> to vector<16x32xf32>
    %67 = arith.mulf %62, %66 : vector<16x32xf32>
    %68 = vector.broadcast %48 : vector<1x32xf32> to vector<16x32xf32>
    %69 = arith.mulf %67, %68 : vector<16x32xf32>
    %70 = vector.broadcast %49 : vector<1x32xf32> to vector<16x32xf32>
    %71 = arith.addf %69, %70 : vector<16x32xf32>
    %72 = arith.truncf %71 : vector<16x32xf32> to vector<16x32xbf16>
    %c0_35 = arith.constant 0 : index
    %c0_36 = arith.constant 0 : index
    %73 = vector.load %arg12[%c0_35, %c0_36] : memref<32x64xbf16, #tpu.memory_space<vmem>>, vector<32x64xbf16>
    %cst_37 = arith.constant dense<0.000000e+00> : vector<16x64xf32>
    %74 = tpu.matmul %72, %73, %cst_37 {dimension_numbers = #tpu.dot_dimension_numbers<[1], [0], [0], [1], [0, 0, 1, 1], [], []>} : vector<16x32xbf16>, vector<32x64xbf16>, vector<16x64xf32> -> vector<16x64xf32>
    %c0_38 = arith.constant 0 : index
    %c0_39 = arith.constant 0 : index
    %75 = vector.load %arg13[%c0_38, %c0_39] : memref<1x64xf32, #tpu.memory_space<vmem>>, vector<1x64xf32>
    %76 = vector.broadcast %75 : vector<1x64xf32> to vector<16x64xf32>
    %77 = arith.addf %74, %76 : vector<16x64xf32>
    %cst_40 = arith.constant 0.000000e+00 : f32
    %78 = vector.broadcast %cst_40 : f32 to vector<16x64xf32>
    %79 = arith.maximumf %77, %78 : vector<16x64xf32>
    %80 = arith.truncf %79 : vector<16x64xf32> to vector<16x64xbf16>
    %c0_41 = arith.constant 0 : index
    %c0_42 = arith.constant 0 : index
    %81 = vector.load %arg14[%c0_41, %c0_42] : memref<64x32xbf16, #tpu.memory_space<vmem>>, vector<64x32xbf16>
    %cst_43 = arith.constant dense<0.000000e+00> : vector<16x32xf32>
    %82 = tpu.matmul %80, %81, %cst_43 {dimension_numbers = #tpu.dot_dimension_numbers<[1], [0], [0], [1], [0, 0, 1, 1], [], []>} : vector<16x64xbf16>, vector<64x32xbf16>, vector<16x32xf32> -> vector<16x32xf32>
    %83 = arith.addf %71, %82 : vector<16x32xf32>
    %c0_44 = arith.constant 0 : index
    %c0_45 = arith.constant 0 : index
    %84 = vector.load %arg15[%c0_44, %c0_45] : memref<1x32xf32, #tpu.memory_space<vmem>>, vector<1x32xf32>
    %85 = vector.broadcast %84 : vector<1x32xf32> to vector<16x32xf32>
    %86 = arith.addf %83, %85 : vector<16x32xf32>
    %c0_46 = arith.constant 0 : index
    %c0_47 = arith.constant 0 : index
    %87 = vector.load %arg16[%c0_46, %c0_47] : memref<1x32xf32, #tpu.memory_space<vmem>>, vector<1x32xf32>
    %c0_48 = arith.constant 0 : index
    %c0_49 = arith.constant 0 : index
    %88 = vector.load %arg17[%c0_48, %c0_49] : memref<1x32xf32, #tpu.memory_space<vmem>>, vector<1x32xf32>
    %cst_50 = arith.constant dense<0.000000e+00> : vector<16xf32>
    %89 = vector.multi_reduction <add>, %86, %cst_50 [1] : vector<16x32xf32> to vector<16xf32>
    %90 = vector.shape_cast %89 : vector<16xf32> to vector<16x1xf32>
    %cst_51 = arith.constant 3.200000e+01 : f32
    %91 = vector.broadcast %cst_51 : f32 to vector<16x1xf32>
    %92 = arith.divf %90, %91 : vector<16x1xf32>
    %93 = vector.broadcast %92 : vector<16x1xf32> to vector<16x32xf32>
    %94 = arith.subf %86, %93 : vector<16x32xf32>
    %95 = arith.mulf %94, %94 : vector<16x32xf32>
    %cst_52 = arith.constant dense<0.000000e+00> : vector<16xf32>
    %96 = vector.multi_reduction <add>, %95, %cst_52 [1] : vector<16x32xf32> to vector<16xf32>
    %97 = vector.shape_cast %96 : vector<16xf32> to vector<16x1xf32>
    %cst_53 = arith.constant 3.200000e+01 : f32
    %98 = vector.broadcast %cst_53 : f32 to vector<16x1xf32>
    %99 = arith.divf %97, %98 : vector<16x1xf32>
    %100 = vector.broadcast %92 : vector<16x1xf32> to vector<16x32xf32>
    %101 = arith.subf %86, %100 : vector<16x32xf32>
    %cst_54 = arith.constant 9.99999974E-6 : f32
    %102 = vector.broadcast %cst_54 : f32 to vector<16x1xf32>
    %103 = arith.addf %99, %102 : vector<16x1xf32>
    %104 = math.rsqrt %103 : vector<16x1xf32>
    %105 = vector.broadcast %104 : vector<16x1xf32> to vector<16x32xf32>
    %106 = arith.mulf %101, %105 : vector<16x32xf32>
    %107 = vector.broadcast %87 : vector<1x32xf32> to vector<16x32xf32>
    %108 = arith.mulf %106, %107 : vector<16x32xf32>
    %109 = vector.broadcast %88 : vector<1x32xf32> to vector<16x32xf32>
    %110 = arith.addf %108, %109 : vector<16x32xf32>
    %111 = arith.truncf %110 : vector<16x32xf32> to vector<16x32xbf16>
    %c0_55 = arith.constant 0 : index
    %c0_56 = arith.constant 0 : index
    %112 = vector.load %arg18[%c0_55, %c0_56] : memref<32x32xbf16, #tpu.memory_space<vmem>>, vector<32x32xbf16>
    %cst_57 = arith.constant dense<0.000000e+00> : vector<16x32xf32>
    %113 = tpu.matmul %111, %112, %cst_57 {dimension_numbers = #tpu.dot_dimension_numbers<[1], [0], [0], [1], [0, 0, 1, 1], [], []>} : vector<16x32xbf16>, vector<32x32xbf16>, vector<16x32xf32> -> vector<16x32xf32>
    %c0_58 = arith.constant 0 : index
    %c0_59 = arith.constant 0 : index
    %114 = vector.load %arg19[%c0_58, %c0_59] : memref<1x32xf32, #tpu.memory_space<vmem>>, vector<1x32xf32>
    %115 = vector.broadcast %114 : vector<1x32xf32> to vector<16x32xf32>
    %116 = arith.addf %113, %115 : vector<16x32xf32>
    %117 = arith.truncf %116 : vector<16x32xf32> to vector<16x32xbf16>
    %c0_60 = arith.constant 0 : index
    %c0_61 = arith.constant 0 : index
    %c0_62 = arith.constant 0 : index
    %118 = vector.load %arg22[%c0_60, %c0_61, %c0_62] : memref<1x16x32xbf16, #tpu.memory_space<vmem>>, vector<1x16x32xbf16>
    %119 = vector.shape_cast %118 : vector<1x16x32xbf16> to vector<16x32xbf16>
    %120 = vector.shape_cast %117 : vector<16x32xbf16> to vector<1x16x32xbf16>
    tpu.vector_store %arg22[%c0_60, %c0_61, %c0_62], %120 {strides = array<i32>} : memref<1x16x32xbf16, #tpu.memory_space<vmem>>, vector<1x16x32xbf16>,
    %c0_63 = arith.constant 0 : index
    %c0_64 = arith.constant 0 : index
    %121 = vector.load %arg20[%c0_63, %c0_64] : memref<32x32xbf16, #tpu.memory_space<vmem>>, vector<32x32xbf16>
    %cst_65 = arith.constant dense<0.000000e+00> : vector<16x32xf32>
    %122 = tpu.matmul %111, %121, %cst_65 {dimension_numbers = #tpu.dot_dimension_numbers<[1], [0], [0], [1], [0, 0, 1, 1], [], []>} : vector<16x32xbf16>, vector<32x32xbf16>, vector<16x32xf32> -> vector<16x32xf32>
    %c0_66 = arith.constant 0 : index
    %c0_67 = arith.constant 0 : index
    %123 = vector.load %arg21[%c0_66, %c0_67] : memref<1x32xf32, #tpu.memory_space<vmem>>, vector<1x32xf32>
    %124 = vector.broadcast %123 : vector<1x32xf32> to vector<16x32xf32>
    %125 = arith.addf %122, %124 : vector<16x32xf32>
    %126 = arith.truncf %125 : vector<16x32xf32> to vector<16x32xbf16>
    %c0_68 = arith.constant 0 : index
    %c0_69 = arith.constant 0 : index
    %c0_70 = arith.constant 0 : index
    %127 = vector.load %arg23[%c0_68, %c0_69, %c0_70] : memref<1x16x32xbf16, #tpu.memory_space<vmem>>, vector<1x16x32xbf16>
    %128 = vector.shape_cast %127 : vector<1x16x32xbf16> to vector<16x32xbf16>
    %129 = vector.shape_cast %126 : vector<16x32xbf16> to vector<1x16x32xbf16>
    tpu.vector_store %arg23[%c0_68, %c0_69, %c0_70], %129 {strides = array<i32>} : memref<1x16x32xbf16, #tpu.memory_space<vmem>>, vector<1x16x32xbf16>,
    return
  }
  func.func @transform_0(%arg0: i32) -> (i32, i32, i32) {
    %c0_i32 = arith.constant 0 : i32
    %c0_i32_0 = arith.constant 0 : i32
    %c0_i32_1 = arith.constant 0 : i32
    return %arg0, %c0_i32, %c0_i32_0 : i32, i32, i32
  }
  func.func @transform_1(%arg0: i32) -> (i32, i32) {
    %c0_i32 = arith.constant 0 : i32
    %c0_i32_0 = arith.constant 0 : i32
    %c0_i32_1 = arith.constant 0 : i32
    return %c0_i32, %c0_i32_0 : i32, i32
  }
  func.func @transform_2(%arg0: i32) -> (i32, i32) {
    %c0_i32 = arith.constant 0 : i32
    %c0_i32_0 = arith.constant 0 : i32
    %c0_i32_1 = arith.constant 0 : i32
    return %c0_i32, %c0_i32_0 : i32, i32
  }
  func.func @transform_3(%arg0: i32) -> (i32, i32) {
    %c0_i32 = arith.constant 0 : i32
    %c0_i32_0 = arith.constant 0 : i32
    %c0_i32_1 = arith.constant 0 : i32
    return %c0_i32, %c0_i32_0 : i32, i32
  }
  func.func @transform_4(%arg0: i32) -> (i32, i32) {
    %c0_i32 = arith.constant 0 : i32
    %c0_i32_0 = arith.constant 0 : i32
    %c0_i32_1 = arith.constant 0 : i32
    return %c0_i32, %c0_i32_0 : i32, i32
  }
  func.func @transform_5(%arg0: i32) -> (i32, i32) {
    %c0_i32 = arith.constant 0 : i32
    %c0_i32_0 = arith.constant 0 : i32
    %c0_i32_1 = arith.constant 0 : i32
    return %c0_i32, %c0_i32_0 : i32, i32
  }
  func.func @transform_6(%arg0: i32) -> (i32, i32) {
    %c0_i32 = arith.constant 0 : i32
    %c0_i32_0 = arith.constant 0 : i32
    %c0_i32_1 = arith.constant 0 : i32
    return %c0_i32, %c0_i32_0 : i32, i32
  }
  func.func @transform_7(%arg0: i32) -> (i32, i32) {
    %c0_i32 = arith.constant 0 : i32
    %c0_i32_0 = arith.constant 0 : i32
    %c0_i32_1 = arith.constant 0 : i32
    return %c0_i32, %c0_i32_0 : i32, i32
  }
  func.func @transform_8(%arg0: i32) -> (i32, i32) {
    %c0_i32 = arith.constant 0 : i32
    %c0_i32_0 = arith.constant 0 : i32
    %c0_i32_1 = arith.constant 0 : i32
    return %c0_i32, %c0_i32_0 : i32, i32
  }
  func.func @transform_9(%arg0: i32) -> (i32, i32) {
    %c0_i32 = arith.constant 0 : i32
    %c0_i32_0 = arith.constant 0 : i32
    %c0_i32_1 = arith.constant 0 : i32
    return %c0_i32, %c0_i32_0 : i32, i32
  }
  func.func @transform_10(%arg0: i32) -> (i32, i32) {
    %c0_i32 = arith.constant 0 : i32
    %c0_i32_0 = arith.constant 0 : i32
    %c0_i32_1 = arith.constant 0 : i32
    return %c0_i32, %c0_i32_0 : i32, i32
  }
  func.func @transform_11(%arg0: i32) -> (i32, i32) {
    %c0_i32 = arith.constant 0 : i32
    %c0_i32_0 = arith.constant 0 : i32
    %c0_i32_1 = arith.constant 0 : i32
    return %c0_i32, %c0_i32_0 : i32, i32
  }
  func.func @transform_12(%arg0: i32) -> (i32, i32) {
    %c0_i32 = arith.constant 0 : i32
    %c0_i32_0 = arith.constant 0 : i32
    %c0_i32_1 = arith.constant 0 : i32
    return %c0_i32, %c0_i32_0 : i32, i32
  }
  func.func @transform_13(%arg0: i32) -> (i32, i32) {
    %c0_i32 = arith.constant 0 : i32
    %c0_i32_0 = arith.constant 0 : i32
    %c0_i32_1 = arith.constant 0 : i32
    return %c0_i32, %c0_i32_0 : i32, i32
  }
  func.func @transform_14(%arg0: i32) -> (i32, i32) {
    %c0_i32 = arith.constant 0 : i32
    %c0_i32_0 = arith.constant 0 : i32
    %c0_i32_1 = arith.constant 0 : i32
    return %c0_i32, %c0_i32_0 : i32, i32
  }
  func.func @transform_15(%arg0: i32) -> (i32, i32) {
    %c0_i32 = arith.constant 0 : i32
    %c0_i32_0 = arith.constant 0 : i32
    %c0_i32_1 = arith.constant 0 : i32
    return %c0_i32, %c0_i32_0 : i32, i32
  }
  func.func @transform_16(%arg0: i32) -> (i32, i32) {
    %c0_i32 = arith.constant 0 : i32
    %c0_i32_0 = arith.constant 0 : i32
    %c0_i32_1 = arith.constant 0 : i32
    return %c0_i32, %c0_i32_0 : i32, i32
  }
  func.func @transform_17(%arg0: i32) -> (i32, i32) {
    %c0_i32 = arith.constant 0 : i32
    %c0_i32_0 = arith.constant 0 : i32
    %c0_i32_1 = arith.constant 0 : i32
    return %c0_i32, %c0_i32_0 : i32, i32
  }
  func.func @transform_18(%arg0: i32) -> (i32, i32) {
    %c0_i32 = arith.constant 0 : i32
    %c0_i32_0 = arith.constant 0 : i32
    %c0_i32_1 = arith.constant 0 : i32
    return %c0_i32, %c0_i32_0 : i32, i32
  }
  func.func @transform_19(%arg0: i32) -> (i32, i32) {
    %c0_i32 = arith.constant 0 : i32
    %c0_i32_0 = arith.constant 0 : i32
    %c0_i32_1 = arith.constant 0 : i32
    return %c0_i32, %c0_i32_0 : i32, i32
  }
  func.func @transform_20(%arg0: i32) -> (i32, i32) {
    %c0_i32 = arith.constant 0 : i32
    %c0_i32_0 = arith.constant 0 : i32
    %c0_i32_1 = arith.constant 0 : i32
    return %c0_i32, %c0_i32_0 : i32, i32
  }
  func.func @transform_21(%arg0: i32) -> (i32, i32, i32) {
    %c0_i32 = arith.constant 0 : i32
    %c0_i32_0 = arith.constant 0 : i32
    %c0_i32_1 = arith.constant 0 : i32
    return %arg0, %c0_i32, %c0_i32_0 : i32, i32, i32
  }
  func.func @transform_22(%arg0: i32) -> (i32, i32, i32) {
    %c0_i32 = arith.constant 0 : i32
    %c0_i32_0 = arith.constant 0 : i32
    %c0_i32_1 = arith.constant 0 : i32
    return %arg0, %c0_i32, %c0_i32_0 : i32, i32, i32
  }
}

</mosaic_0001>

<bundles_post_ra>
// kernel: encode.1
= control target key start
LH: loop header
LB: loop body
LE: loop exit
PB: predicated region body
PF: predicated region fallthrough
CT: control target
= control target key end

     0   :  { %s2465_s0 = inlined_call_operand.vmem [shape: f32[2,16,64], index: 0, kind: input, shape index: {}]   ;;  %s2466_s1 = inlined_call_operand.vmem [shape: bf16[64,48], index: 1, kind: input, shape index: {}]   ;;  %s2467_s2 = inlined_call_operand.vmem [shape: f32[1,48], index: 2, kind: input, shape index: {}]   ;;  %s2468_s3 = inlined_call_operand.vmem [shape: bf16[48,32], index: 3, kind: input, shape index: {}]   ;;  %s2469_s4 = inlined_call_operand.vmem [shape: f32[1,32], index: 4, kind: input, shape index: {}, may-alias: {4,8,10,14,16,18,20}]   ;;  %s2470_s5 = inlined_call_operand.vmem [shape: bf16[32,96], index: 5, kind: input, shape index: {}]   ;;  %s2471_s6 = inlined_call_operand.vmem [shape: f32[1,96], index: 6, kind: input, shape index: {}]   ;;  %s2472_s7 = inlined_call_operand.vmem [shape: bf16[32,32], index: 7, kind: input, shape index: {}]   ;;  %s2473_s8 = inlined_call_operand.vmem [shape: f32[1,32], index: 8, kind: input, shape index: {}, may-alias: {4,8,10,14,16,18,20}]   ;;  %s2474_s9 = inlined_call_operand.vmem [shape: f32[1,32], index: 9, kind: input, shape index: {}, may-alias: {9,15}]   ;;  %s2475_s10 = inlined_call_operand.vmem [shape: f32[1,32], index: 10, kind: input, shape index: {}, may-alias: {4,8,10,14,16,18,20}]   ;;  %s2476_s11 = inlined_call_operand.vmem [shape: bf16[32,64], index: 11, kind: input, shape index: {}]   ;;  %s2477_s12 = inlined_call_operand.vmem [shape: f32[1,64], index: 12, kind: input, shape index: {}]   ;;  %s2478_s13 = inlined_call_operand.vmem [shape: bf16[64,32], index: 13, kind: input, shape index: {}]   ;;  %s2479_s14 = inlined_call_operand.vmem [shape: f32[1,32], index: 14, kind: input, shape index: {}, may-alias: {4,8,10,14,16,18,20}]   ;;  %s2480_s15 = inlined_call_operand.vmem [shape: f32[1,32], index: 15, kind: input, shape index: {}, may-alias: {9,15}]   ;;  %s2481_s16 = inlined_call_operand.vmem [shape: f32[1,32], index: 16, kind: input, shape index: {}, may-alias: {4,8,10,14,16,18,20}]   ;;  %s2482_s17 = inlined_call_operand.vmem [shape: bf16[32,32], index: 17, kind: input, shape index: {}]   ;;  %s2483_s18 = inlined_call_operand.vmem [shape: f32[1,32], index: 18, kind: input, shape index: {}, may-alias: {4,8,10,14,16,18,20}]   ;;  %s2484_s19 = inlined_call_operand.vmem [shape: bf16[32,32], index: 19, kind: input, shape index: {}]   ;;  %s2485_s20 = inlined_call_operand.vmem [shape: f32[1,32], index: 20, kind: input, shape index: {}, may-alias: {4,8,10,14,16,18,20}]   ;;  %s2486_s21 = inlined_call_operand.hbm [shape: bf16[2,16,32], index: 21, kind: output, shape index: {0}]   ;;  %s2487_s22 = inlined_call_operand.hbm [shape: bf16[2,16,32], index: 22, kind: output, shape index: {1}]  }
   0x1   :  { %2505 = sst [smem:[#allocation14_spill]] %s2465_s0 }
   0x2   :  { %2506 = sst [smem:[#allocation15_spill]] %s2466_s1 }
   0x3   :  { %2507 = sst [smem:[#allocation16_spill]] %s2467_s2 }
   0x4   :  { %2508 = sst [smem:[#allocation17_spill]] %s2468_s3 }
   0x5   :  { %2509 = sst [smem:[#allocation18_spill]] %s2469_s4 }
   0x6   :  { %2510 = sst [smem:[#allocation19_spill]] %s2470_s5 }
   0x7   :  { %2511 = sst [smem:[#allocation20_spill]] %s2471_s6 }
   0x8   :  { %2512 = sst [smem:[#allocation21_spill]] %s2472_s7 }
   0x9   :  { %2513 = sst [smem:[#allocation22_spill]] %s2473_s8 }
   0xa   :  { %2514 = sst [smem:[#allocation23_spill]] %s2474_s9 }
   0xb   :  { %2515 = sst [smem:[#allocation24_spill]] %s2486_s21 }
   0xc   :  { %2516 = sst [smem:[#allocation25_spill]] %s2487_s22 }
   0xd   :  { %28 = vsyncpa [#allocation3], 0 }
   0xe   :  { %30 = vsyncpa [#allocation3 + $0x1], 0 }
   0xf   :  { %31 = vsyncpa [#allocation5], 0 }
  0x10   :  { %33 = vsyncpa [#allocation5 + $0x1], 0  ;;  %s2141_s3 = smov 0   ;;  %s2143_s28 = smov 0  }
  0x11   :  { %s2145_s29 = smov 0   ;;  %s2147_s30 = smov 0  }
  0x12 LB: > { %2517 = sst [smem:[#allocation8_spill]] %s2005_s3  ;;  %s2162_s4 = sadd.s32 4294967295, %s2017_s30   ;;  %s2017_s30 = sphi %s2147_s30, %s2545_s30   ;;  %s2013_s29 = sphi %s2145_s29, %s2547_s29   ;;  %s2009_s28 = sphi %s2143_s28, %s2549_s28   ;;  %s2005_s3 = sphi %s2141_s3, %s2548_s3  }
  0x13   : > { %2518 = sst [smem:[#allocation9_spill]] %s2013_s29  ;;  %s1652_s0 = sadd.s32 4294967294, %s2017_s30  }
  0x14   : > { %2519 = sst [smem:[#allocation10_spill]] %s2017_s30  ;;  %s2166_s23 = sadd.s32 1, %s2017_s30  }
  0x15   : > { %2520 = sst [smem:[#allocation11_spill]] %s2166_s23  ;;  %s492_s1 = sadd.s32 1, %s2013_s29 }
  0x16   : > { %s489_s5 = ssub.s32 %s2017_s30, %s2166_s23  ;;  %p502_p0 = scmp.ne.s32.totalorder %s2013_s29, %s2009_s28 }
  0x17   : > { %p490_p1 = scmp.eq.s32.totalorder %s489_s5, 0  ;;  %p503_p2 = scmp.eq.s32.totalorder %s2162_s4, 1 }
  0x18   : > { %p508_p3 = scmp.ne.s32.totalorder %s2009_s28, %s2005_s3  ;;  %p509_p4 = scmp.eq.s32.totalorder %s1652_s0, 1 }
  0x19   : > { %s2177_s24 = scalar_select %p490_p1, %s2013_s29, %s492_s1  }
  0x1a   : > { %p2179_p5 = por %p503_p2, %p502_p0  ;;  %p2183_p6 = por %p509_p4, %p508_p3 }
  0x1b   : > { %2521 = sst [smem:[#allocation12_spill]] %s2177_s24  ;;  %p1655_p7 = scmp.ge.s32.totalorder %s2017_s30, 1 }
  0x1c   : > { %s2523_s25 = scalar_select %p2183_p6, 1, 0 }
  0x1d   : > { %p621_p8 = scmp.lt.s32.totalorder %s2017_s30, 3 }
  0x1e   : > { %2524 = sst [smem:[#allocation13_spill]] %s2523_s25 }
  0x1f   : > { %p622_p9 = pnand %p1655_p7, %p621_p8 }
  0x20   : > { %s2525_s27 = sld [smem:[#allocation15_spill]] (!%p622_p9)  ;;  %p688_p10 = scmp.lt.s32.totalorder (!%p622_p9), %s2162_s4, 1 }
  0x21   : > { %625 = sbr.rel (%p622_p9) target bundleno = 2960 (0xb90), region = 104  ;;  %s2526_s24 = sld [smem:[#allocation17_spill]] (!%p622_p9) }
  0x22   : > { %s2527_s3 = sld [smem:[#allocation14_spill]] (!%p622_p9)  ;;  %s2503_s29 = sshll.u32 (!%p622_p9), %s2162_s4, 7 }
  0x23   : > { %s2528_s25 = sld [smem:[#allocation16_spill]] (!%p622_p9) }
  0x24   : > { %s2529_s2 = sld [smem:[#allocation19_spill]] (!%p622_p9) }
  0x25   : > { %s2530_s21 = sld [smem:[#allocation18_spill]] (!%p622_p9) }
  0x26   : > { %v1890_v0 = vld [vmem:[%s2525_s27 + $0x18] sm:$0xff]   ;;  %v2019_v1 = vmov 0.0   ;;  %v1891_v2 = vld [vmem:[%s2525_s27 + $0x10] sm:$0xff]   ;;  %vm2020_vm0 = vmmov 0   ;;  %s689_s5 = scalar_select %p688_p10, %s2162_s4, 1  ;;  %v1892_v4 = vld [vmem:[%s2525_s27 + $0x8] sm:$0xff]  }
  0x27   : > { %1755 = vmatprep.subr.bf16.mxu0 %v2019_v1  ;;  %1767 = vmatprep.subr.bf16.mxu1 %v2019_v1  ;;  %v1894_v3 = vld [vmem:[%s2526_s24 + $0x10] sm:$0xff]   ;;  %v1893_v5 = vld [vmem:[%s2525_s27] sm:$0xff]   ;;  %vm736_vm1 = vcmask 523264   ;;  %v1895_v9 = vld [vmem:[%s2526_s24 + $0x8] sm:$0xff]   ;;  %vm813_vm2 = vcmask 392192   ;;  %vm882_vm3 = vcmask 261120  }
  0x28   : > { %1756 = vmatpush3.bf16.msra.mxu0 %v1890_v0  ;;  %1763 = vmatprep.mubr.msk.bf16.mxu0 %vm2020_vm0, %v2019_v1  ;;  %s1715_s0 = sshll.u32 %s689_s5, 4  ;;  %v1896_v10 = vld [vmem:[%s2526_s24] sm:$0xff]   ;;  %s2531_s23 = sld [smem:[#allocation20_spill]]  ;;  %vm980_vm4 = vcmask 130048   ;;  %vm1446_vm5 = vcmask 257024  }
  0x29   : > { %1757 = vmatprep.subr.bf16.mxu0 %v2019_v1  ;;  %1773 = vmatprep.mubr.msk.bf16.mxu1 %vm2020_vm0, %v2019_v1  ;;  %s692_s30 = scalar_lea.vmem %s2527_s3, %s1715_s0  ;;  %v1660_v12 = vld [vmem:[%s2528_s25] ss:$0 sm:$0xff]  ;;  %s2021_s25 = smov 96  }
  0x2a   : > { %1768 = vmatpush3.bf16.msra.mxu1 %v1894_v3  ;;  %v694_v6 = vld [vmem:[%s692_s30] sm:$0xff]  ;;  %v695_v7 = vld [vmem:[%s692_s30 + $0x8] sm:$0xff]  ;;  %s2500_s5 = smov 64   ;;  %s2532_s7 = sld [smem:[#allocation21_spill]] }
  0x2b   : > { %1769 = vmatprep.subr.bf16.mxu1 %v2019_v1  ;;  %v696_v8 = vpack.c.bf16 %v695_v7, %v694_v6  ;;  %v1897_v19 = vld [vmem:[%s2529_s2 + $0x8] sm:$0xff]   ;;  %v1898_v20 = vld [vmem:[%s2529_s2] sm:$0xff]   ;;  %s2533_s8 = sld [smem:[#allocation22_spill]] }
  0x2c   : > { %1758 = vmatpush3.bf16.msra.mxu0 %v1891_v2  ;;  %v1666_v22 = vld [vmem:[%s2530_s21] ss:$0 sm:$0xff]  ;;  %s2534_s9 = sld [smem:[#allocation23_spill]]  ;;  %s2023_s21 = smov [#allocation2]  }
  0x2d   : > { %1759 = vmatprep.subr.bf16.mxu0 %v2019_v1  ;;  %s2535_s26 = sld [smem:[#allocation24_spill]]  ;;  %s1931_s22 = sshll.u32 %s2023_s21, 4  ;;  %s1932_s22 = int_to_ptr.vmem [resolvable:$false] %s1931_s22 }
  0x2e   : > { %1770 = vmatpush3.bf16.msra.mxu1 %v1895_v9  ;;  %v1671_v30 = vld [vmem:[%s2531_s23] ss:$0 sm:$0xff]  ;;  %s2362_s23 = sand.u32 1, %s2009_s28  }
  0x2f   : > { %1771 = vmatprep.subr.bf16.mxu1 %v2019_v1  ;;  %s2499_s0 = sshll.u32 %s2362_s23, 3 }
  0x30   : > { %1760 = vmatpush3.bf16.msra.mxu0 %v1892_v4  ;;  %v1899_v2 = vld [vmem:[%s2532_s7 + $0x8] sm:$0xff]   ;;  %v1900_v3 = vld [vmem:[%s2532_s7] sm:$0xff]   ;;  %s680_s1 = scalar_lea.vmem [#allocation2], %s2499_s0  ;;  %s1933_s7 = scalar_lea.vmem %s1932_s22, 256 }
  0x31   : > { %1761 = vmatprep.subr.bf16.mxu0 %v2019_v1  ;;  %s1542_s3 = sshll.u32 %s680_s1, 4  ;;  %s2372_s3 = int_to_ptr.vmem [resolvable:$true] %s1542_s3 }
  0x32   : > { %1772 = vmatpush3.bf16.msra.mxu1 %v1896_v10  ;;  %v1680_v10 = vld [vmem:[%s2533_s8] ss:$0 sm:$0xff]  ;;  %s1927_s2 = scalar_lea.vmem %s2372_s3, 128  ;;  %p1934_p0 = scmp.lt.s32.totalorder %s2372_s3, %s1932_s22 }
  0x33   : > { %1777 = vmatprep.subr.bf16.mxu1 %v2019_v1  ;;  %s2382_s0 = scalar_lea.hbm %s2535_s26, %s2503_s29  ;;  %p1928_p11 = scmp.ne.s32.totalorder %s2372_s3, %s1927_s2 }
  0x34   : > { %1762 = vmatpush3.bf16.msra.mxu0 %v1893_v5  ;;  %p1935_p1 = scmp.lt.s32.totalorder %s1933_s7, %s1927_s2 }
  0x35   : > { %1785 = vmatprep.subr.bf16.mxu0 %v2019_v1  ;;  %p1929_p12 = pnand %p1928_p11, %p2179_p5 }
  0x36   : > { %p1936_p2 = por %p1935_p1, %p1934_p0 }
  0x37   : > { %1764 = vmatmul.mubr.msk.bf16.vlgmr.msra.gmra.mxu0 %vm736_vm1, %v696_v8  ;;  %p1930_p13 = pneg %p1929_p12 }
  0x38   : > { %1787 = vmatprep.mubr.msk.bf16.mxu0 %vm2020_vm0, %v2019_v1 }
  0x39   : > { %p1937_p3 = pnand %p1936_p2, %p1930_p13 }
  0xf7   : > { %v774_v11 = vpop.f32.mrf.mxu0 }
  0xf8   : > { %v775_v15 = vadd.f32 %v1660_v12, %v774_v11 }
  0xf9   : > { %v1765_v13 = vpop.f32.mrf.mxu0 }
  0xfb   : > { %v777_v14 = vpop.f32.mrf.mxu0 }
  0xfc   : > { %v778_v16 = vadd.f32 %v1660_v12, %v777_v14 }
  0xfd   : > { %v1766_v17 = vpop.f32.mrf.mxu0 }
  0xfe   : > { %v781_v18 = vpack.c.bf16 %v778_v16, %v775_v15 }
 0x100   : > { %1774 = vmatmul.mubr.msk.bf16.vlgmr.msra.gmra.mxu1 %vm813_vm2, %v781_v18 }
 0x101   : > { %1781 = vmatprep.mubr.msk.bf16.mxu1 %vm2020_vm0, %v2019_v1  ;;  %1778 = vmatpush3.bf16.msra.mxu1 %v1897_v19 }
 0x102   : > { %1779 = vmatprep.subr.bf16.mxu1 %v2019_v1 }
 0x105   : > { %1780 = vmatpush3.bf16.msra.mxu1 %v1898_v20 }
 0x106   : > { %1791 = vmatprep.subr.bf16.mxu1 %v2019_v1 }
 0x1c0   : > { %v851_v21 = vpop.f32.mrf.mxu1 }
 0x1c1   : > { %v2247_v25 = vadd.f32 %v1666_v22, %v851_v21 }
 0x1c2   : > { %v1775_v23 = vpop.f32.mrf.mxu1 }
 0x1c4   : > { %v854_v24 = vpop.f32.mrf.mxu1 }
 0x1c5   : > { %v2249_v26 = vadd.f32 %v1666_v22, %v854_v24 }
 0x1c6   : > { %v1776_v27 = vpop.f32.mrf.mxu1 }
 0x1c7   : > { %v858_v28 = vpack.c.bf16 %v2249_v26, %v2247_v25 }
 0x1c9   : > { %1782 = vmatmul.mubr.msk.bf16.vlgmr.msra.gmra.mxu1 %vm882_vm3, %v858_v28 }
 0x1ca   : > { %1793 = vmatprep.mubr.msk.bf16.mxu1 %vm2020_vm0, %v2019_v1 }
 0x289   : > { %v920_v29 = vpop.f32.mrf.mxu1 }
 0x28a   : > { %v921_v33 = vadd.f32 %v1671_v30, %v920_v29 }
 0x28b   : > { %v1783_v31 = vpop.f32.mrf.mxu1 }
 0x28c   : > { %v1902_v31 = vld [vmem:[%s2476_s11] sm:$0xff]  }
 0x28d   : > { %v923_v32 = vpop.f32.mrf.mxu1 }
 0x28e   : > { %v924_v34 = vadd.f32 %v1671_v30, %v923_v32  ;;  %v1901_v30 = vld [vmem:[%s2476_s11 + $0x8] sm:$0xff]   ;;  %v1903_v32 = vld [vmem:[%s2478_s13 + $0x18] sm:$0xff]  }
 0x28f   : > { %v1784_v35 = vpop.f32.mrf.mxu1 }
 0x290   : > { %v927_v36 = vpack.c.bf16 %v924_v34, %v921_v33 }
 0x292   : > { %929 = vrot.lane.b32.xlu0 %v927_v36, %s2021_s25 }
 0x304   : > { %v930_v37 = vpop.permute.xlu0 %929 }
 0x305   : > { %v935_v38 = vsel %vm882_vm3, %v930_v37, 0 }
 0x306   : > { %1786 = vmatpush3.bf16.xpose.msra.mxu0 %v935_v38 }
 0x307   : > { %1797 = vmatprep.subr.bf16.mxu0 %v2019_v1 }
 0x30d   : > { %1788 = vmatmul.mubr.msk.bf16.vlgmr.msra.gmra.mxu0 %vm882_vm3, %v927_v36 }
 0x30e   : > { %1801 = vmatprep.mubr.msk.bf16.mxu0 %vm2020_vm0, %v2019_v1  ;;  %1798 = vmatpush3.bf16.msra.mxu0 %v1899_v2 }
 0x30f   : > { %1799 = vmatprep.subr.bf16.mxu0 %v2019_v1 }
 0x312   : > { %1800 = vmatpush3.bf16.msra.mxu0 %v1900_v3 }
 0x313   : > { %1813 = vmatprep.subr.bf16.mxu0 %v2019_v1 }
 0x3cd   : > { %v971_v39 = vpop.f32.mrf.mxu0 }
 0x3ce   : > { %v978_v40 = vmul.f32 0.17677669, %v971_v39 }
 0x3cf   : > { %v1789_v41 = vpop.f32.mrf.mxu0 }
 0x3d0   : > { %v981_v42 = vsel %vm980_vm4, %v978_v40, -inf  ;;  %v1681_v41 = vld [vmem:[%s2534_s9] ss:$0 sm:$0xff] }
 0x3d1   : > { %982 = vmax.xlane.f32.xlu0 %v981_v42  ;;  %v974_v43 = vpop.f32.mrf.mxu0 }
 0x3d2   : > { %v979_v44 = vmul.f32 0.17677669, %v974_v43 }
 0x3d3   : > { %v1790_v45 = vpop.f32.mrf.mxu0 }
 0x3d4   : > { %v984_v46 = vsel %vm980_vm4, %v979_v44, -inf  ;;  %v1682_v45 = vld [vmem:[%s2475_s10] ss:$0 sm:$0xff] }
 0x3d5   : > { %985 = vmax.xlane.f32.xlu1 %v984_v46 }
 0x45a   : > { %v983_v47 = vpop.xlane.xlu0 %982 }
 0x45b   : > { %v987_v48 = vsub.f32 %v978_v40, %v983_v47 }
 0x45d   : > { %v989_v49 = vmul.f32 1.442695, %v987_v48 }
 0x45e   : > { %v986_v50 = vpop.xlane.xlu1 %985 }
 0x45f   : > { %1911 = vpow2.f32 %v989_v49  ;;  %v988_v51 = vsub.f32 %v979_v44, %v986_v50  ;;  %v1904_v50 = vld [vmem:[%s2478_s13 + $0x10] sm:$0xff]  }
 0x461   : > { %v991_v52 = vmul.f32 1.442695, %v988_v51  ;;  %v1905_v51 = vld [vmem:[%s2478_s13 + $0x8] sm:$0xff]  }
 0x463   : > { %1913 = vpow2.f32 %v991_v52  ;;  %v1906_v52 = vld [vmem:[%s2478_s13] sm:$0xff]  }
 0x46c   : > { %v1912_v53 = vpop.eup %1911 }
 0x46d   : > { %v993_v54 = vsel %vm980_vm4, %v1912_v53, 0.0 }
 0x46e   : > { %994 = vadd.xlane.f32.xlu1 %v993_v54 }
 0x470   : > { %v1914_v55 = vpop.eup %1913 }
 0x471   : > { %v996_v56 = vsel %vm980_vm4, %v1914_v55, 0.0 }
 0x472   : > { %997 = vadd.xlane.f32.xlu1 %v996_v56 }
 0x483   : > { %1004 = vrot.lane.b32.xlu1 %v927_v36, %s2500_s5 }
 0x4f7   : > { %v995_v57 = vpop.xlane.xlu1 %994 }
 0x4f8   : > { %1915 = vrcp.f32 %v995_v57 }
 0x4fb   : > { %v998_v58 = vpop.xlane.xlu1 %997 }
 0x4fc   : > { %1917 = vrcp.f32 %v998_v58 }
 0x4ff   : > { %v1005_v59 = vpop.permute.xlu1 %1004 }
 0x500   : > { %1792 = vmatpush3.bf16.msra.mxu1 %v1005_v59 }
 0x501   : > { %1805 = vmatprep.subr.bf16.mxu1 %v2019_v1 }
 0x505   : > { %v1916_v60 = vpop.eup %1915 }
 0x506   : > { %v1001_v62 = vmul.f32 %v1916_v60, %v1912_v53  ;;  %v1683_v53 = vld [vmem:[%s2477_s12] ss:$0 sm:$0xff] }
 0x509   : > { %v1918_v61 = vpop.eup %1917 }
 0x50a   : > { %v1002_v63 = vmul.f32 %v1918_v61, %v1914_v55 }
 0x50c   : > { %v1003_v0 = vpack.c.bf16 %v1002_v63, %v1001_v62 }
 0x50e   : > { %1794 = vmatmul.mubr.msk.bf16.vlgmr.msra.gmra.mxu1 %vm980_vm4, %v1003_v0  ;;  %v1692_v0 = vld [vmem:[%s2479_s14] ss:$0 sm:$0xff] }
 0x50f   : > { %1809 = vmatprep.mubr.msk.bf16.mxu1 %vm2020_vm0, %v2019_v1  ;;  %1806 = vmatpush3.bf16.msra.mxu1 %v1901_v30 }
 0x510   : > { %1807 = vmatprep.subr.bf16.mxu1 %v2019_v1 }
 0x513   : > { %1808 = vmatpush3.bf16.msra.mxu1 %v1902_v31  ;;  %v1693_v31 = vld [vmem:[%s2480_s15] ss:$0 sm:$0xff] }
 0x514   : > { %1825 = vmatprep.subr.bf16.mxu1 %v2019_v1 }
 0x5ce   : > { %v1044_v4 = vpop.f32.mrf.mxu1 }
 0x5d0   : > { %v1795_v5 = vpop.f32.mrf.mxu1 }
 0x5d2   : > { %v1047_v6 = vpop.f32.mrf.mxu1 }
 0x5d3   : > { %v1051_v7 = vpack.c.bf16 %v1047_v6, %v1044_v4 }
 0x5d4   : > { %v1796_v8 = vpop.f32.mrf.mxu1 }
 0x5d5   : > { %1802 = vmatmul.mubr.msk.bf16.vlgmr.msra.gmra.mxu0 %vm882_vm3, %v1051_v7 }
 0x5d6   : > { %1821 = vmatprep.mubr.msk.bf16.mxu0 %vm2020_vm0, %v2019_v1  ;;  %1814 = vmatpush3.bf16.msra.mxu0 %v1903_v32 }
 0x5d7   : > { %1815 = vmatprep.subr.bf16.mxu0 %v2019_v1 }
 0x5da   : > { %1816 = vmatpush3.bf16.msra.mxu0 %v1904_v50 }
 0x5db   : > { %1817 = vmatprep.subr.bf16.mxu0 %v2019_v1 }
 0x5de   : > { %1818 = vmatpush3.bf16.msra.mxu0 %v1905_v51 }
 0x5df   : > { %1819 = vmatprep.subr.bf16.mxu0 %v2019_v1 }
 0x5e2   : > { %1820 = vmatpush3.bf16.msra.mxu0 %v1906_v52 }
 0x695   : > { %v1105_v9 = vpop.f32.mrf.mxu0 }
 0x696   : > { %v1112_v11 = vadd.f32 %v1105_v9, %v2247_v25 }
 0x697   : > { %v1803_v12 = vpop.f32.mrf.mxu0 }
 0x698   : > { %v1121_v13 = vadd.f32 %v1680_v10, %v1112_v11 }
 0x699   : > { %v1108_v14 = vpop.f32.mrf.mxu0 }
 0x69a   : > { %v1113_v15 = vadd.f32 %v1108_v14, %v2249_v26  ;;  %v1125_v16 = vsel %vm882_vm3, %v1121_v13, 0.0 }
 0x69b   : > { %1126 = vadd.xlane.f32.xlu1 %v1125_v16  ;;  %v1804_v17 = vpop.f32.mrf.mxu0 }
 0x69c   : > { %v1122_v18 = vadd.f32 %v1680_v10, %v1113_v15 }
 0x69e   : > { %v1128_v19 = vsel %vm882_vm3, %v1122_v18, 0.0 }
 0x69f   : > { %1129 = vadd.xlane.f32.xlu0 %v1128_v19 }
 0x724   : > { %v1127_v20 = vpop.xlane.xlu1 %1126 }
 0x725   : > { %v1132_v21 = vmul.f32 0.03125, %v1127_v20 }
 0x727   : > { %v1134_v22 = vsub.f32 %v1121_v13, %v1132_v21  ;;  %v1907_v21 = vld [vmem:[%s2482_s17 + $0x8] sm:$0xff]  }
 0x728   : > { %v1130_v23 = vpop.xlane.xlu0 %1129 }
 0x729   : > { %v1133_v24 = vmul.f32 0.03125, %v1130_v23  ;;  %v1136_v27 = vmul.f32 %v1134_v22, %v1134_v22 }
 0x72b   : > { %v1135_v25 = vsub.f32 %v1122_v18, %v1133_v24  ;;  %v1138_v28 = vsel %vm882_vm3, %v1136_v27, 0.0 }
 0x72c   : > { %1139 = vadd.xlane.f32.xlu0 %v1138_v28 }
 0x72d   : > { %v1137_v29 = vmul.f32 %v1135_v25, %v1135_v25 }
 0x72f   : > { %v1141_v26 = vsel %vm882_vm3, %v1137_v29, 0.0 }
 0x730   : > { %1142 = vadd.xlane.f32.xlu0 %v1141_v26 }
 0x7b5   : > { %v1140_v33 = vpop.xlane.xlu0 %1139 }
 0x7b6   : > { %v1144_v34 = vmul.f32 0.03125, %v1140_v33 }
 0x7b8   : > { %v1146_v35 = vadd.f32 1e-05, %v1144_v34 }
 0x7b9   : > { %v1143_v36 = vpop.xlane.xlu0 %1142 }
 0x7ba   : > { %1919 = vrsqrt.f32 %v1146_v35  ;;  %v1145_v37 = vmul.f32 0.03125, %v1143_v36  ;;  %v1694_v35 = vld [vmem:[%s2481_s16] ss:$0 sm:$0xff] }
 0x7bc   : > { %v1147_v38 = vadd.f32 1e-05, %v1145_v37 }
 0x7be   : > { %1921 = vrsqrt.f32 %v1147_v38 }
 0x7c7   : > { %v1920_v39 = vpop.eup %1919 }
 0x7c8   : > { %v1150_v40 = vmul.f32 %v1920_v39, %v1134_v22  ;;  %v1908_v22 = vld [vmem:[%s2482_s17] sm:$0xff]   ;;  %v1909_v39 = vld [vmem:[%s2484_s19 + $0x8] sm:$0xff]  }
 0x7ca   : > { %v1158_v44 = vmul.f32 %v1681_v41, %v1150_v40 }
 0x7cb   : > { %v1922_v42 = vpop.eup %1921 }
 0x7cc   : > { %v1151_v43 = vmul.f32 %v1922_v42, %v1135_v25  ;;  %v1166_v47 = vadd.f32 %v1682_v45, %v1158_v44  ;;  %v1695_v42 = vld [vmem:[%s2483_s18] ss:$0 sm:$0xff] }
 0x7ce   : > { %v1159_v46 = vmul.f32 %v1681_v41, %v1151_v43  ;;  %v1910_v41 = vld [vmem:[%s2484_s19] sm:$0xff]  }
 0x7d0   : > { %v1167_v48 = vadd.f32 %v1682_v45, %v1159_v46 }
 0x7d2   : > { %v1168_v49 = vpack.c.bf16 %v1167_v48, %v1166_v47 }
 0x7d4   : > { %1810 = vmatmul.mubr.msk.bf16.vlgmr.msra.gmra.mxu1 %vm882_vm3, %v1168_v49  ;;  %v1701_v49 = vld [vmem:[%s2485_s20] ss:$0 sm:$0xff] }
 0x7d5   : > { %1829 = vmatprep.mubr.msk.bf16.mxu1 %vm2020_vm0, %v2019_v1  ;;  %1826 = vmatpush3.bf16.msra.mxu1 %v1907_v21 }
 0x7d6   : > { %1827 = vmatprep.subr.bf16.mxu1 %v2019_v1 }
 0x7d9   : > { %1828 = vmatpush3.bf16.msra.mxu1 %v1908_v22 }
 0x7da   : > { %1833 = vmatprep.subr.bf16.mxu1 %v2019_v1 }
 0x894   : > { %v1229_v54 = vpop.f32.mrf.mxu1 }
 0x895   : > { %v1230_v56 = vadd.f32 %v1683_v53, %v1229_v54 }
 0x896   : > { %v1811_v55 = vpop.f32.mrf.mxu1 }
 0x897   : > { %v1236_v60 = vmax.f32 %v1230_v56, 0.0 }
 0x898   : > { %v1232_v57 = vpop.f32.mrf.mxu1 }
 0x899   : > { %v1233_v58 = vadd.f32 %v1683_v53, %v1232_v57 }
 0x89a   : > { %v1812_v59 = vpop.f32.mrf.mxu1 }
 0x89b   : > { %v1237_v61 = vmax.f32 %v1233_v58, 0.0 }
 0x89d   : > { %v1238_v62 = vpack.c.bf16 %v1237_v61, %v1236_v60 }
 0x89f   : > { %1822 = vmatmul.mubr.msk.bf16.vlgmr.msra.gmra.mxu0 %vm736_vm1, %v1238_v62 }
 0x95f   : > { %v1308_v63 = vpop.f32.mrf.mxu0 }
 0x960   : > { %v1315_v2 = vadd.f32 %v1308_v63, %v1166_v47 }
 0x961   : > { %v1823_v3 = vpop.f32.mrf.mxu0 }
 0x962   : > { %v1324_v4 = vadd.f32 %v1692_v0, %v1315_v2 }
 0x963   : > { %v1311_v5 = vpop.f32.mrf.mxu0 }
 0x964   : > { %v1316_v6 = vadd.f32 %v1311_v5, %v1167_v48  ;;  %v1328_v7 = vsel %vm882_vm3, %v1324_v4, 0.0 }
 0x965   : > { %1329 = vadd.xlane.f32.xlu0 %v1328_v7  ;;  %v1824_v8 = vpop.f32.mrf.mxu0 }
 0x966   : > { %v1325_v9 = vadd.f32 %v1692_v0, %v1316_v6 }
 0x968   : > { %v1331_v10 = vsel %vm882_vm3, %v1325_v9, 0.0 }
 0x969   : > { %1332 = vadd.xlane.f32.xlu0 %v1331_v10 }
 0x9ee   : > { %v1330_v11 = vpop.xlane.xlu0 %1329 }
 0x9ef   : > { %v1334_v12 = vmul.f32 0.03125, %v1330_v11 }
 0x9f1   : > { %v1336_v13 = vsub.f32 %v1324_v4, %v1334_v12 }
 0x9f2   : > { %v1333_v14 = vpop.xlane.xlu0 %1332 }
 0x9f3   : > { %v1335_v15 = vmul.f32 0.03125, %v1333_v14  ;;  %v1338_v16 = vmul.f32 %v1336_v13, %v1336_v13 }
 0x9f5   : > { %v1337_v17 = vsub.f32 %v1325_v9, %v1335_v15  ;;  %v1340_v18 = vsel %vm882_vm3, %v1338_v16, 0.0 }
 0x9f6   : > { %1341 = vadd.xlane.f32.xlu0 %v1340_v18 }
 0x9f7   : > { %v1339_v19 = vmul.f32 %v1337_v17, %v1337_v17 }
 0x9f9   : > { %v1343_v20 = vsel %vm882_vm3, %v1339_v19, 0.0 }
 0x9fa   : > { %1344 = vadd.xlane.f32.xlu0 %v1343_v20 }
 0xa7f   : > { %v1342_v23 = vpop.xlane.xlu0 %1341 }
 0xa80   : > { %v1346_v24 = vmul.f32 0.03125, %v1342_v23 }
 0xa82   : > { %v1348_v27 = vadd.f32 1e-05, %v1346_v24 }
 0xa83   : > { %v1345_v25 = vpop.xlane.xlu0 %1344 }
 0xa84   : > { %1923 = vrsqrt.f32 %v1348_v27  ;;  %v1347_v28 = vmul.f32 0.03125, %v1345_v25 }
 0xa86   : > { %v1349_v29 = vadd.f32 1e-05, %v1347_v28 }
 0xa88   : > { %1925 = vrsqrt.f32 %v1349_v29 }
 0xa91   : > { %v1924_v26 = vpop.eup %1923 }
 0xa92   : > { %v1352_v30 = vmul.f32 %v1924_v26, %v1336_v13 }
 0xa94   : > { %v1360_v34 = vmul.f32 %v1693_v31, %v1352_v30 }
 0xa95   : > { %v1926_v32 = vpop.eup %1925 }
 0xa96   : > { %v1353_v33 = vmul.f32 %v1926_v32, %v1337_v17  ;;  %v1368_v37 = vadd.f32 %v1694_v35, %v1360_v34 }
 0xa98   : > { %v1361_v36 = vmul.f32 %v1693_v31, %v1353_v33 }
 0xa9a   : > { %v1369_v38 = vadd.f32 %v1694_v35, %v1361_v36 }
 0xa9c   : > { %v1370_v40 = vpack.c.bf16 %v1369_v38, %v1368_v37 }
 0xa9e   : > { %1830 = vmatmul.mubr.msk.bf16.vlgmr.msra.gmra.mxu1 %vm882_vm3, %v1370_v40 }
 0xa9f   : > { %1834 = vmatpush3.bf16.msra.mxu1 %v1909_v39  ;;  %1837 = vmatprep.mubr.msk.bf16.mxu1 %vm2020_vm0, %v2019_v1 }
 0xaa0   : > { %1835 = vmatprep.subr.bf16.mxu1 %v2019_v1 }
 0xaa3   : > { %1836 = vmatpush3.bf16.msra.mxu1 %v1910_v41 }
 0xaa6   : > { %1838 = vmatmul.mubr.msk.bf16.vlgmr.msra.gmra.mxu1 %vm882_vm3, %v1370_v40 }
 0xb5e   : > { %v1431_v43 = vpop.f32.mrf.mxu1 }
 0xb5f   : > { %v1432_v44 = vadd.f32 %v1695_v42, %v1431_v43 }
 0xb60   : > { %v1831_v45 = vpop.f32.mrf.mxu1 }
 0xb61   : > { %v1716_v46 = vpack.c.bf16 %v1432_v44, %v1432_v44 }
 0xb62   : > { %v1434_v1 = vpop.f32.mrf.mxu1 }
 0xb63   : > { %1447 = vst.msk [vmem:[%s680_s1] sm:$0xf] %vm1446_vm5, %v1716_v46  ;;  %v1435_v47 = vadd.f32 %v1695_v42, %v1434_v1 }
 0xb64   : > { %v1832_v48 = vpop.f32.mrf.mxu1 }
 0xb65   : > { %v1717_v50 = vpack.c.bf16 %v1435_v47, %v1435_v47 }
 0xb66   : > { %v1506_v51 = vpop.f32.mrf.mxu1 }
 0xb67   : > { %1448 = vst.msk [vmem:[%s680_s1 + $0x4] sm:$0xf] %vm1446_vm5, %v1717_v50  ;;  %v1507_v52 = vadd.f32 %v1701_v49, %v1506_v51 }
 0xb68   : > { %v1839_v53 = vpop.f32.mrf.mxu1 }
 0xb69   : > { %1940 = shalt.err (!%p1937_p3)
}
 0xb6a   : > { %s1941_s1 = scalar_lea.hbm %s2382_s0, 128  ;;  %s1945_s21 = scalar_lea.hbm %s2535_s26, 256 }
 0xb6b   : > { %p1942_p4 = scmp.ne.s32.totalorder %s2382_s0, %s1941_s1  ;;  %p1946_p9 = scmp.lt.s32.totalorder %s2382_s0, %s2535_s26 }
 0xb6c   : > { %p1947_p10 = scmp.lt.s32.totalorder %s1945_s21, %s1941_s1 }
 0xb6d   : > { %p1943_p7 = pnand %p1942_p4, %p2179_p5 }
 0xb6e   : > { %p1948_p11 = por %p1947_p10, %p1946_p9 }
 0xb6f   : > { %p1944_p8 = pneg %p1943_p7 }
 0xb71   : > { %p1949_p12 = pnand %p1948_p11, %p1944_p8 }
 0xb73   : > { %1952 = shalt.err (!%p1949_p12)
}
 0xb74   : > { %s2504_s7 = smov 4   ;;  %s2536_s2 = smov 64   ;;  %v1718_v54 = vpack.c.bf16 %v1507_v52, %v1507_v52  ;;  %v1509_v55 = vpop.f32.mrf.mxu1 }
 0xb75   : > { %s2537_s22 = scalar_lea.sflag [#allocation3], %s2362_s23  ;;  %s2538_s5 = sshll.u32 %s2362_s23, 3  ;;  %v1510_v56 = vadd.f32 %v1701_v49, %v1509_v55 }
 0xb76   : > { %1841 = dma.vmem_to_hbm [thread:$0]  (%p2179_p5), %s2372_s3, 128, %s2382_s0, %s2537_s22, %s2536_s2, %s2536_s2, %s2504_s7   ;;  %v1840_v57 = vpop.f32.mrf.mxu1 }
 0xb77   : > { %s687_s29 = scalar_lea.vmem [#allocation4], %s2538_s5  ;;  %v1719_v58 = vpack.c.bf16 %v1510_v56, %v1510_v56  ;;  %s2539_s30 = sshll.u32 %s2162_s4, 7 }
 0xb78   : > { %s1558_s1 = sshll.u32 %s687_s29, 4  ;;  %1521 = vst.msk [vmem:[%s687_s29] sm:$0xf] %vm1446_vm5, %v1718_v54  ;;  %s2540_s8 = sld [smem:[#allocation25_spill]]  ;;  %s2414_s1 = int_to_ptr.vmem [resolvable:$true] %s1558_s1 }
 0xb79   : > { %1522 = vst.msk [vmem:[%s687_s29 + $0x4] sm:$0xf] %vm1446_vm5, %v1719_v58  ;;  %s1529_s3 = scalar_lea.sflag [#allocation5], %s2362_s23  ;;  %s1953_s22 = scalar_lea.vmem %s2414_s1, 128 }
 0xb7a   : > { %p1954_p13 = scmp.ne.s32.totalorder %s2414_s1, %s1953_s22  ;;  %s2025_s5 = smov [#allocation4]  }
 0xb7b   : > { %s1957_s7 = sshll.u32 %s2025_s5, 4  ;;  %s1958_s7 = int_to_ptr.vmem [resolvable:$false] %s1957_s7 }
 0xb7c   : > { %p1955_p0 = pnand %p1954_p13, %p2179_p5  ;;  %s1959_s9 = scalar_lea.vmem %s1958_s7, 256 }
 0xb7d   : > { %p1960_p2 = scmp.lt.s32.totalorder %s2414_s1, %s1958_s7  ;;  %p1961_p3 = scmp.lt.s32.totalorder %s1959_s9, %s1953_s22 }
 0xb7e   : > { %s2421_s0 = scalar_lea.hbm %s2540_s8, %s2539_s30  ;;  %p1956_p1 = pneg %p1955_p0 }
 0xb7f   : > { %p1962_p4 = por %p1961_p3, %p1960_p2 }
 0xb81   : > { %p1963_p7 = pnand %p1962_p4, %p1956_p1 }
 0xb83   : > { %1966 = shalt.err (!%p1963_p7)
}
 0xb84   : > { %s1967_s4 = scalar_lea.hbm %s2421_s0, 128  ;;  %s1971_s30 = scalar_lea.hbm %s2540_s8, 256 }
 0xb85   : > { %p1968_p8 = scmp.ne.s32.totalorder %s2421_s0, %s1967_s4  ;;  %p1972_p11 = scmp.lt.s32.totalorder %s2421_s0, %s2540_s8 }
 0xb86   : > { %p1973_p12 = scmp.lt.s32.totalorder %s1971_s30, %s1967_s4 }
 0xb87   : > { %p1969_p9 = pnand %p1968_p8, %p2179_p5 }
 0xb88   : > { %p1974_p13 = por %p1973_p12, %p1972_p11 }
 0xb89   : > { %p1970_p10 = pneg %p1969_p9 }
 0xb8b   : > { %p1975_p0 = pnand %p1974_p13, %p1970_p10 }
 0xb8d   : > { %1978 = shalt.err (!%p1975_p0)
}
 0xb8e   : > { %s2541_s9 = smov 4  }
 0xb8f   : > { %1842 = dma.vmem_to_hbm [thread:$0]  (%p2179_p5), %s2414_s1, 128, %s2421_s0, %s1529_s3, %s2536_s2, %s2536_s2, %s2541_s9  }
 0xb90 PF: > { %s2542_s7 = sld [smem:[#allocation10_spill]] }
 0xb91   : > { %s2543_s22 = sld [smem:[#allocation8_spill]] }
 0xb96   : > { %p1852_p1 = scmp.ge.s32.totalorder %s2542_s7, 2 }
 0xb97   : > { %s1573_s23 = sand.u32 1, %s2543_s22  }
 0xb98   : > { %p1846_p2 = pnand %p1852_p1, %p2183_p6  ;;  %s1574_s4 = scalar_lea.sflag [#allocation3], %s1573_s23 }
 0xb9a   : > { %p1847_p3 = pneg %p1846_p2 }
 0xb9c   : > { %1996 = dma.done.wait (%p1847_p3), %s1574_s4, 128  }
 0xb9d   : > { %1998 = vsyncadd (%p1847_p3), %s1574_s4, 4294967168  ;;  %s1583_s29 = scalar_lea.sflag [#allocation5], %s1573_s23 }
 0xb9e   : > { %2000 = dma.done.wait (%p1847_p3), %s1583_s29, 128  }
 0xb9f   : > { %2002 = vsyncadd (%p1847_p3), %s1583_s29, 4294967168  ;;  %s2545_s30 = sld [smem:[#allocation11_spill]]  ;;  %s2548_s3 = smov %s2009_s28 }
 0xba0   : > { %s2546_s6 = sld [smem:[#allocation9_spill]] }
 0xba1   : > { %s2547_s29 = sld [smem:[#allocation12_spill]] }
 0xba5   : > { %p36_p5 = scmp.ge.s32.totalorder %s2545_s30, 4  }
 0xba6   : > { %s2549_s28 = smov %s2546_s6 }
 0xba7   :  { %38 = sbr.rel (!%p36_p5) target bundleno = 18 (0x12), region = 156 }
 0xbac   :  { %1588 = vsyncpa [#allocation3], 1 }
 0xbad   :  { %1590 = vsyncpa [#allocation3 + $0x1], 1 }
 0xbae   :  { %1591 = vsyncpa [#allocation5], 1 }
 0xbaf   :  { %1593 = vsyncpa [#allocation5 + $0x1], 1 }

</bundles_post_ra>
